<compile_context>
chip_gen: v7x
topology: tpu7x:2x2x1
jax: 0.10.0
libtpu: 0.0.40
codegen_flags: <defaults>
</compile_context>

<pallas_src>
import functools

import jax
import jax.numpy as jnp
from jax.experimental import pallas as pl
from jax.experimental.pallas import tpu as pltpu

LANE = 128      # lane width: out-feature padding target
SUBLANE = 8     # sublane width: batch padding target


def _round_up(n, m):
    return ((n + m - 1) // m) * m


def _device_info():
    """(is_v7x, vmem_capacity_bytes, num_tensorcores) from the default device."""
    try:
        kind = jax.devices()[0].device_kind.lower()
    except Exception:
        kind = ""
    is_v7 = "v7" in kind
    vmem_cap = (64 << 20) if is_v7 else (128 << 20)
    num_tc = 2 if is_v7 else 1
    return is_v7, vmem_cap, num_tc


# --------------------------------------------------------------------------
# Fused MLP kernel: one grid step = one batch tile through ALL layers.
# refs layout: x_ref, w1, b1, w2, b2, ..., wn, bn, o_ref
#   wi: (in_p, out_p)  pre-transposed + zero padded (f32 or bf16)
#   bi: (1, out_p)     zero padded, f32
# --------------------------------------------------------------------------
def _mlp_fused_kernel(x_ref, *refs, num_layers):
    o_ref = refs[-1]
    h = x_ref[...]
    for i in range(num_layers):
        w = refs[2 * i][...]
        b = refs[2 * i + 1][...]
        lhs = h.astype(w.dtype) if h.dtype != w.dtype else h
        y = jnp.dot(lhs, w, preferred_element_type=jnp.float32) + b
        if i == num_layers - 1:
            h = jax.nn.sigmoid(y)          # EUP logistic, f32
        else:
            h = jnp.maximum(y, 0.0)        # ReLU on VPU, f32
    o_ref[...] = h.astype(o_ref.dtype)


# --------------------------------------------------------------------------
# One-time parameter repack (hoisted out of the per-call path).
# --------------------------------------------------------------------------
def pack_fc_params(params, weight_dtype=None):
    """Pre-transpose to (in_f, out_f) and zero-pad out-feature dims to 128.

    params: list of (w (out_f, in_f), b (out_f,)) in PyTorch layout.
    The first layer's K dim stays unpadded (in_f); later K dims equal the
    previous layer's padded out width so the chain stays consistent.
    If weight_dtype is None it is auto-chosen: bf16 when the f32 resident
    footprint would exceed ~60% of the chip's VMEM, else f32.
    """
    if weight_dtype is None:
        total_f32 = 0
        for idx, (w, _) in enumerate(params):
            out_f, in_f = w.shape
            in_p = in_f if idx == 0 else _round_up(in_f, LANE)
            out_p = _round_up(out_f, LANE)
            total_f32 += in_p * out_p * 4 + out_p * 4
        _, vmem_cap, _ = _device_info()
        weight_dtype = jnp.bfloat16 if total_f32 > int(vmem_cap * 0.6) else jnp.float32
        # TODO(synk): if even bf16 weights exceed the budget, stream the widest
        # layer over its out-feature dim with an extra "arbitrary" grid axis.

    packed = []
    for idx, (w, b) in enumerate(params):
        out_f, in_f = w.shape
        in_p = in_f if idx == 0 else _round_up(in_f, LANE)
        out_p = _round_up(out_f, LANE)
        wt = jnp.zeros((in_p, out_p), weight_dtype).at[:in_f, :out_f].set(
            w.T.astype(weight_dtype))
        bp = jnp.zeros((1, out_p), jnp.float32).at[0, :out_f].set(b)
        packed.append((wt, bp))
    return packed


def fc_forward(x, packed, out_features):
    """Forward pass of FC(*sizes): hidden layers ReLU, final layer Sigmoid.

    x: (B, in_f) f32
    packed: output of pack_fc_params (weights (in_p, out_p), biases (1, out_p))
    out_features: true (unpadded) width of the final layer.
    returns (B, out_features) f32
    """
    B, in_f = x.shape
    num_layers = len(packed)
    assert packed[0][0].shape[0] == in_f, "x feature dim must match first layer"
    out_p_last = packed[-1][0].shape[1]

    is_v7, vmem_cap, num_tc = _device_info()

    # Batch tiling: multiple of 8 sublanes. Cap 512 on 128-MiB chips, 256 on
    # v7x; on v7x also keep >= 2 grid steps so both TensorCores get work.
    B8 = _round_up(B, SUBLANE)
    cap = 256 if is_v7 else 512
    tb = min(B8, cap)
    if num_tc > 1 and B8 > SUBLANE:
        tb = min(tb, _round_up(pl.cdiv(B8, num_tc), SUBLANE))
    B_pad = _round_up(B, tb)

    x_pad = x if B_pad == B else jnp.zeros((B_pad, in_f), x.dtype).at[:B, :].set(x)

    grid = (B_pad // tb,)

    in_specs = [pl.BlockSpec((tb, in_f), lambda i: (i, 0))]   # x tile (dbl-buffered)
    flat_wb = []
    weight_bytes = 0
    act_bytes = 0
    for wt, bp in packed:
        ip, op = wt.shape
        # Grid-invariant residents: single-buffered to halve VMEM footprint.
        in_specs.append(pl.BlockSpec((ip, op), lambda i: (0, 0),
                                     pipeline_mode=pl.Buffered(1)))
        in_specs.append(pl.BlockSpec((1, op), lambda i: (0, 0),
                                     pipeline_mode=pl.Buffered(1)))
        flat_wb.extend([wt, bp])
        weight_bytes += ip * op * wt.dtype.itemsize + op * 4
        act_bytes += tb * op * 4                              # per-layer f32 temp

    io_bytes = 2 * tb * in_f * 4 + 2 * tb * out_p_last * 4    # double-buffered I/O
    vmem_limit = int((weight_bytes + act_bytes + io_bytes) * 1.3) + (4 << 20)
    vmem_limit = min(max(vmem_limit, 32 << 20), vmem_cap - (8 << 20))

    kernel = functools.partial(_mlp_fused_kernel, num_layers=num_layers)

    out_padded = pl.pallas_call(
        kernel,
        out_shape=jax.ShapeDtypeStruct((B_pad, out_p_last), jnp.float32),
        grid_spec=pltpu.PrefetchScalarGridSpec(
            num_scalar_prefetch=0,
            grid=grid,
            in_specs=in_specs,
            out_specs=pl.BlockSpec((tb, out_p_last), lambda i: (i, 0)),
        ),
        compiler_params=pltpu.CompilerParams(
            dimension_semantics=("parallel",),
            vmem_limit_bytes=vmem_limit,
        ),
    )(x_pad, *flat_wb)

    # Drop batch padding and lane padding of the final (sigmoid) layer.
    return out_padded[:B, :out_features]


def init_fc_params(key, sizes):
    """Deterministic init matching nn.Linear's default (uniform +- 1/sqrt(fan_in))."""
    params = []
    for i in range(len(sizes) - 1):
        in_f, out_f = sizes[i], sizes[i + 1]
        key, kw, kb = jax.random.split(key, 3)
        bound = 1.0 / (in_f ** 0.5)
        w = jax.random.uniform(kw, (out_f, in_f), jnp.float32, -bound, bound)
        b = jax.random.uniform(kb, (out_f,), jnp.float32, -bound, bound)
        params.append((w, b))
    return params


def fc_reference(x, params):
    """Pure-JAX reference for correctness checking."""
    n = len(params)
    for i, (w, b) in enumerate(params):
        x = x @ w.T + b
        x = jax.nn.sigmoid(x) if i == n - 1 else jnp.maximum(x, 0.0)
    return x


if __name__ == "__main__":
    sizes = (32, 64, 64, 16)   # FC(32, 64, 64, 16)
    batch = 8

    key = jax.random.PRNGKey(0)
    key, kx = jax.random.split(key)
    x = jax.random.normal(kx, (batch, sizes[0]), jnp.float32)

    params = init_fc_params(key, sizes)

    # One-time repack (transpose + pad) — hoisted out of the forward path.
    packed = pack_fc_params(params)

    out = fc_forward(x, packed, out_features=sizes[-1])
    out = jax.block_until_ready(out)

    ref = fc_reference(x, params)
    assert out.shape == (batch, sizes[-1])
    assert jnp.allclose(out, ref, atol=1e-5, rtol=1e-5), "mismatch vs reference"

    print("KERNEL_OK")
</pallas_src>

<mosaic_0001>
module attributes {stable_mosaic.version = 11 : i64} {
  func.func @_mlp_fused_kernel(%arg0: i32, %arg1: memref<8x32xf32, #tpu.memory_space<vmem>>, %arg2: memref<32x128xf32, #tpu.memory_space<vmem>>, %arg3: memref<1x128xf32, #tpu.memory_space<vmem>>, %arg4: memref<128x128xf32, #tpu.memory_space<vmem>>, %arg5: memref<1x128xf32, #tpu.memory_space<vmem>>, %arg6: memref<128x128xf32, #tpu.memory_space<vmem>>, %arg7: memref<1x128xf32, #tpu.memory_space<vmem>>, %arg8: memref<8x128xf32, #tpu.memory_space<vmem>>) attributes {dimension_semantics = [#tpu.dimension_semantics<parallel>], iteration_bounds = array<i64: 1>, scalar_prefetch = 0 : i64, scratch_operands = 0 : i64, tpu.core_type = #tpu.core_type<tc>, window_params = [{transform_indices = @transform_0, window_bounds = array<i64: 8, 32>}, {pipeline_mode = #tpu.pipeline_mode<synchronous>, transform_indices = @transform_1, window_bounds = array<i64: 32, 128>}, {pipeline_mode = #tpu.pipeline_mode<synchronous>, transform_indices = @transform_2, window_bounds = array<i64: 1, 128>}, {pipeline_mode = #tpu.pipeline_mode<synchronous>, transform_indices = @transform_3, window_bounds = array<i64: 128, 128>}, {pipeline_mode = #tpu.pipeline_mode<synchronous>, transform_indices = @transform_4, window_bounds = array<i64: 1, 128>}, {pipeline_mode = #tpu.pipeline_mode<synchronous>, transform_indices = @transform_5, window_bounds = array<i64: 128, 128>}, {pipeline_mode = #tpu.pipeline_mode<synchronous>, transform_indices = @transform_6, window_bounds = array<i64: 1, 128>}, {transform_indices = @transform_7, window_bounds = array<i64: 8, 128>}]} {
    %c0 = arith.constant 0 : index
    %c0_0 = arith.constant 0 : index
    %0 = vector.load %arg1[%c0, %c0_0] : memref<8x32xf32, #tpu.memory_space<vmem>>, vector<8x32xf32>
    %c0_1 = arith.constant 0 : index
    %c0_2 = arith.constant 0 : index
    %1 = vector.load %arg2[%c0_1, %c0_2] : memref<32x128xf32, #tpu.memory_space<vmem>>, vector<32x128xf32>
    %c0_3 = arith.constant 0 : index
    %c0_4 = arith.constant 0 : index
    %2 = vector.load %arg3[%c0_3, %c0_4] : memref<1x128xf32, #tpu.memory_space<vmem>>, vector<1x128xf32>
    %cst = arith.constant dense<0.000000e+00> : vector<8x128xf32>
    %3 = tpu.matmul %0, %1, %cst {dimension_numbers = #tpu.dot_dimension_numbers<[1], [0], [0], [1], [0, 0, 1, 1], [], []>} : vector<8x32xf32>, vector<32x128xf32>, vector<8x128xf32> -> vector<8x128xf32>
    %4 = vector.broadcast %2 : vector<1x128xf32> to vector<8x128xf32>
    %5 = arith.addf %3, %4 : vector<8x128xf32>
    %cst_5 = arith.constant 0.000000e+00 : f32
    %6 = vector.broadcast %cst_5 : f32 to vector<8x128xf32>
    %7 = arith.maximumf %5, %6 : vector<8x128xf32>
    %c0_6 = arith.constant 0 : index
    %c0_7 = arith.constant 0 : index
    %8 = vector.load %arg4[%c0_6, %c0_7] : memref<128x128xf32, #tpu.memory_space<vmem>>, vector<128x128xf32>
    %c0_8 = arith.constant 0 : index
    %c0_9 = arith.constant 0 : index
    %9 = vector.load %arg5[%c0_8, %c0_9] : memref<1x128xf32, #tpu.memory_space<vmem>>, vector<1x128xf32>
    %cst_10 = arith.constant dense<0.000000e+00> : vector<8x128xf32>
    %10 = tpu.matmul %7, %8, %cst_10 {dimension_numbers = #tpu.dot_dimension_numbers<[1], [0], [0], [1], [0, 0, 1, 1], [], []>} : vector<8x128xf32>, vector<128x128xf32>, vector<8x128xf32> -> vector<8x128xf32>
    %11 = vector.broadcast %9 : vector<1x128xf32> to vector<8x128xf32>
    %12 = arith.addf %10, %11 : vector<8x128xf32>
    %cst_11 = arith.constant 0.000000e+00 : f32
    %13 = vector.broadcast %cst_11 : f32 to vector<8x128xf32>
    %14 = arith.maximumf %12, %13 : vector<8x128xf32>
    %c0_12 = arith.constant 0 : index
    %c0_13 = arith.constant 0 : index
    %15 = vector.load %arg6[%c0_12, %c0_13] : memref<128x128xf32, #tpu.memory_space<vmem>>, vector<128x128xf32>
    %c0_14 = arith.constant 0 : index
    %c0_15 = arith.constant 0 : index
    %16 = vector.load %arg7[%c0_14, %c0_15] : memref<1x128xf32, #tpu.memory_space<vmem>>, vector<1x128xf32>
    %cst_16 = arith.constant dense<0.000000e+00> : vector<8x128xf32>
    %17 = tpu.matmul %14, %15, %cst_16 {dimension_numbers = #tpu.dot_dimension_numbers<[1], [0], [0], [1], [0, 0, 1, 1], [], []>} : vector<8x128xf32>, vector<128x128xf32>, vector<8x128xf32> -> vector<8x128xf32>
    %18 = vector.broadcast %16 : vector<1x128xf32> to vector<8x128xf32>
    %19 = arith.addf %17, %18 : vector<8x128xf32>
    %20 = arith.negf %19 : vector<8x128xf32>
    %21 = math.exp %20 : vector<8x128xf32>
    %cst_17 = arith.constant 1.000000e+00 : f32
    %22 = vector.broadcast %cst_17 : f32 to vector<8x128xf32>
    %23 = arith.addf %22, %21 : vector<8x128xf32>
    %24 = arith.divf %22, %23 : vector<8x128xf32>
    %c0_18 = arith.constant 0 : index
    %c0_19 = arith.constant 0 : index
    %25 = vector.load %arg8[%c0_18, %c0_19] : memref<8x128xf32, #tpu.memory_space<vmem>>, vector<8x128xf32>
    tpu.vector_store %arg8[%c0_18, %c0_19], %24 {strides = array<i32>} : memref<8x128xf32, #tpu.memory_space<vmem>>, vector<8x128xf32>,
    return
  }
  func.func @transform_0(%arg0: i32) -> (i32, i32) {
    %c0_i32 = arith.constant 0 : i32
    %c0_i32_0 = arith.constant 0 : i32
    return %arg0, %c0_i32 : i32, i32
  }
  func.func @transform_1(%arg0: i32) -> (i32, i32) {
    %c0_i32 = arith.constant 0 : i32
    %c0_i32_0 = arith.constant 0 : i32
    %c0_i32_1 = arith.constant 0 : i32
    return %c0_i32, %c0_i32_0 : i32, i32
  }
  func.func @transform_2(%arg0: i32) -> (i32, i32) {
    %c0_i32 = arith.constant 0 : i32
    %c0_i32_0 = arith.constant 0 : i32
    %c0_i32_1 = arith.constant 0 : i32
    return %c0_i32, %c0_i32_0 : i32, i32
  }
  func.func @transform_3(%arg0: i32) -> (i32, i32) {
    %c0_i32 = arith.constant 0 : i32
    %c0_i32_0 = arith.constant 0 : i32
    %c0_i32_1 = arith.constant 0 : i32
    return %c0_i32, %c0_i32_0 : i32, i32
  }
  func.func @transform_4(%arg0: i32) -> (i32, i32) {
    %c0_i32 = arith.constant 0 : i32
    %c0_i32_0 = arith.constant 0 : i32
    %c0_i32_1 = arith.constant 0 : i32
    return %c0_i32, %c0_i32_0 : i32, i32
  }
  func.func @transform_5(%arg0: i32) -> (i32, i32) {
    %c0_i32 = arith.constant 0 : i32
    %c0_i32_0 = arith.constant 0 : i32
    %c0_i32_1 = arith.constant 0 : i32
    return %c0_i32, %c0_i32_0 : i32, i32
  }
  func.func @transform_6(%arg0: i32) -> (i32, i32) {
    %c0_i32 = arith.constant 0 : i32
    %c0_i32_0 = arith.constant 0 : i32
    %c0_i32_1 = arith.constant 0 : i32
    return %c0_i32, %c0_i32_0 : i32, i32
  }
  func.func @transform_7(%arg0: i32) -> (i32, i32) {
    %c0_i32 = arith.constant 0 : i32
    %c0_i32_0 = arith.constant 0 : i32
    return %arg0, %c0_i32 : i32, i32
  }
}

</mosaic_0001>

<bundles_post_ra>
// kernel: tpu_custom_call.1
= control target key start
LH: loop header
LB: loop body
LE: loop exit
PB: predicated region body
PF: predicated region fallthrough
CT: control target
= control target key end

     0   :  { %12 = vsyncpa [#allocation3], 0  ;;  %s838_s0 = inlined_call_operand.hbm [shape: f32[8,32], index: 0, kind: input, shape index: {}]   ;;  %s839_s1 = inlined_call_operand.hbm [shape: f32[32,128], index: 1, kind: input, shape index: {}]   ;;  %s840_s2 = inlined_call_operand.vmem [shape: f32[1,128], index: 2, kind: input, shape index: {}]   ;;  %s841_s3 = inlined_call_operand.hbm [shape: f32[128,128], index: 3, kind: input, shape index: {}]   ;;  %s842_s4 = inlined_call_operand.vmem [shape: f32[1,128], index: 4, kind: input, shape index: {}]   ;;  %s843_s5 = inlined_call_operand.hbm [shape: f32[128,128], index: 5, kind: input, shape index: {}]   ;;  %s844_s6 = inlined_call_operand.vmem [shape: f32[1,128], index: 6, kind: input, shape index: {}]   ;;  %s845_s7 = inlined_call_operand.hbm [shape: f32[8,128], index: 7, kind: output, shape index: {}]  }
   0x1   :  { %13 = vsyncpa [#allocation6], 0 }
   0x2   :  { %14 = vsyncpa [#allocation9], 0 }
   0x3   :  { %15 = vsyncpa [#allocation4], 0  ;;  %s689_s24 = smov [#allocation5]   ;;  %s571_s28 = scalar_lea.hbm %s839_s1, 512 }
   0x4   :  { %s31_s25 = sshll.u32 %s689_s24, 4  ;;  %p572_p0 = scmp.ne.s32.totalorder %s839_s1, %s571_s28  ;;  %s32_s25 = int_to_ptr.vmem [resolvable:$true] %s31_s25 }
   0x5   :  { %p575_p1 = scmp.lt.u32.totalorder %s571_s28, %s839_s1 }
   0x7   :  { %p577_p2 = pnand %p575_p1, %p572_p0 }
   0x9   :  { %580 = shalt.err (!%p577_p2)
}
   0xa   :  { %s581_s10 = scalar_lea.vmem %s32_s25, 512  ;;  %p586_p4 = scmp.lt.s32.totalorder %s32_s25, %s32_s25 }
   0xb   :  { %p582_p3 = scmp.ne.s32.totalorder %s32_s25, %s581_s10  ;;  %p587_p5 = scmp.lt.s32.totalorder %s581_s10, %s581_s10 }
   0xd   :  { %p588_p6 = por %p587_p5, %p586_p4 }
   0xf   :  { %p589_p7 = pnand %p588_p6, %p582_p3 }
  0x11   :  { %592 = shalt.err (!%p589_p7)
}
  0x12   :  { %s690_s11 = smov 128   ;;  %s691_s12 = smov 8  }
  0x13   :  { %37 = dma.hbm_to_vmem [thread:$0]  %s839_s1, 512, %s32_s25, [#allocation6], %s690_s11, %s690_s11, %s691_s12  }
  0x14   :  { %s692_s15 = smov [#allocation2]   ;;  %s693_s17 = smov [#allocation7]  }
  0x15   :  { %s22_s16 = sshll.u32 %s692_s15, 4  ;;  %s45_s18 = sshll.u32 %s693_s17, 4  ;;  %s23_s16 = int_to_ptr.vmem [resolvable:$true] %s22_s16  ;;  %s46_s18 = int_to_ptr.vmem [resolvable:$true] %s45_s18 }
  0x16   :  { %s593_s21 = scalar_lea.hbm %s838_s0, 128 }
  0x17   :  { %p594_p8 = scmp.ne.s32.totalorder %s838_s0, %s593_s21  ;;  %p597_p9 = scmp.lt.u32.totalorder %s593_s21, %s838_s0 }
  0x19   :  { %p599_p10 = pnand %p597_p9, %p594_p8 }
  0x1b   :  { %602 = shalt.err (!%p599_p10)
}
  0x1c   :  { %s603_s1 = scalar_lea.vmem %s23_s16, 128  ;;  %p608_p12 = scmp.lt.s32.totalorder %s23_s16, %s23_s16 }
  0x1d   :  { %p604_p11 = scmp.ne.s32.totalorder %s23_s16, %s603_s1  ;;  %p609_p13 = scmp.lt.s32.totalorder %s603_s1, %s603_s1 }
  0x1f   :  { %p610_p0 = por %p609_p13, %p608_p12 }
  0x21   :  { %p611_p1 = pnand %p610_p0, %p604_p11 }
  0x23   :  { %614 = shalt.err (!%p611_p1)
}
  0x24   :  { %25 = dma.hbm_to_vmem [thread:$0]  %s838_s0, 128, %s23_s16, [#allocation3]  }
  0x25   :  { %s615_s30 = scalar_lea.hbm %s841_s3, 2048 }
  0x26   :  { %p616_p2 = scmp.ne.s32.totalorder %s841_s3, %s615_s30  ;;  %p619_p3 = scmp.lt.u32.totalorder %s615_s30, %s841_s3 }
  0x28   :  { %p621_p4 = pnand %p619_p3, %p616_p2 }
  0x2a   :  { %624 = shalt.err (!%p621_p4)
}
  0x2b   :  { %s625_s14 = scalar_lea.vmem %s46_s18, 2048  ;;  %p630_p6 = scmp.lt.s32.totalorder %s46_s18, %s46_s18 }
  0x2c   :  { %p626_p5 = scmp.ne.s32.totalorder %s46_s18, %s625_s14  ;;  %p631_p7 = scmp.lt.s32.totalorder %s625_s14, %s625_s14 }
  0x2e   :  { %p632_p8 = por %p631_p7, %p630_p6 }
  0x30   :  { %p633_p9 = pnand %p632_p8, %p626_p5 }
  0x32   :  { %636 = shalt.err (!%p633_p9)
}
  0x33   :  { %51 = dma.hbm_to_vmem [thread:$0]  %s841_s3, 2048, %s46_s18, [#allocation6], %s690_s11, %s690_s11, %s691_s12  }
  0x34   :  { %s694_s16 = smov [#allocation8]   ;;  %s637_s21 = scalar_lea.hbm %s843_s5, 2048 }
  0x35   :  { %s59_s17 = sshll.u32 %s694_s16, 4  ;;  %p638_p10 = scmp.ne.s32.totalorder %s843_s5, %s637_s21  ;;  %s60_s17 = int_to_ptr.vmem [resolvable:$true] %s59_s17 }
  0x36   :  { %p641_p11 = scmp.lt.u32.totalorder %s637_s21, %s843_s5 }
  0x38   :  { %p643_p12 = pnand %p641_p11, %p638_p10 }
  0x3a   :  { %646 = shalt.err (!%p643_p12)
}
  0x3b   :  { %s647_s1 = scalar_lea.vmem %s60_s17, 2048  ;;  %p652_p0 = scmp.lt.s32.totalorder %s60_s17, %s60_s17 }
  0x3c   :  { %p648_p13 = scmp.ne.s32.totalorder %s60_s17, %s647_s1  ;;  %p653_p1 = scmp.lt.s32.totalorder %s647_s1, %s647_s1 }
  0x3e   :  { %p654_p2 = por %p653_p1, %p652_p0 }
  0x40   :  { %p655_p3 = pnand %p654_p2, %p648_p13 }
  0x42   :  { %658 = shalt.err (!%p655_p3)
}
  0x43   :  { %65 = dma.hbm_to_vmem [thread:$0]  %s843_s5, 2048, %s60_s17, [#allocation9], %s690_s11, %s690_s11, %s691_s12  }
  0x44   :  { %681 = dma.done.wait [#allocation3], 128  }
  0x45   :  { %682 = vsyncadd [#allocation3], 4294967168 }
  0x46   :  { %683 = dma.done.wait [#allocation6], 2560  }
  0x47   :  { %684 = vsyncadd [#allocation6], 4294964736 }
  0x48   :  { %685 = dma.done.wait [#allocation9], 2048  }
  0x49   :  { %686 = vsyncadd [#allocation9], 4294965248  ;;  %v695_v0 = vmov 0.0|0.0   ;;  %vm696_vm0 = vmmov 0   ;;  %v697_v1 = vmov 0.0   ;;  %v81_v2 = vld [vmem:[#allocation5] sm:$0xff] }
  0x4a   :  { %503 = vmatprep.subr.bf16.mxu0 %v695_v0  ;;  %430 = vmatprep.mubr.msk.f32.mxu0 %vm696_vm0, %v697_v1  ;;  %v82_v3 = vld [vmem:[#allocation5 + $0x8] sm:$0xff]  ;;  %v83_v4 = vld [vmem:[#allocation5 + $0x10] sm:$0xff]  ;;  %v84_v6 = vld [vmem:[#allocation5 + $0x18] sm:$0xff]  ;;  %vm92_vm1 = vcmask 261120   ;;  %s698_s28 = smov [#allocation10]  }
  0x4b   :  { %509 = vmatprep.subr.bf16.mxu1 %v695_v0  ;;  %465 = vmatprep.mubr.msk.f32.mxu1 %vm696_vm0, %v697_v1  ;;  %v504_v5 = vpack.c.bf16 %v82_v3, %v81_v2  ;;  %v167_v7 = vld [vmem:[#allocation7] sm:$0xff]  ;;  %v168_v8 = vld [vmem:[#allocation7 + $0x8] sm:$0xff]  ;;  %v169_v9 = vld [vmem:[#allocation7 + $0x10] sm:$0xff]  ;;  %v507_v11 = vpack.c.bf16 %v84_v6, %v83_v4  ;;  %s367_s29 = sshll.u32 %s698_s28, 4  ;;  %s368_s29 = int_to_ptr.vmem [resolvable:$true] %s367_s29 }
  0x4c   :  { %v170_v10 = vld [vmem:[#allocation7 + $0x18] sm:$0xff]  ;;  %v510_v12 = vpack.c.bf16 %v168_v8, %v167_v7  ;;  %v171_v14 = vld [vmem:[#allocation7 + $0x20] sm:$0xff]  ;;  %v172_v15 = vld [vmem:[#allocation7 + $0x28] sm:$0xff]  ;;  %p664_p5 = scmp.lt.s32.totalorder %s368_s29, %s368_s29 }
  0x4d   :  { %505 = vmatpush3.bf16.msra.mxu0 %v504_v5  ;;  %v513_v13 = vpack.c.bf16 %v170_v10, %v169_v9  ;;  %v80_v16 = vld [vmem:[#allocation2] sm:$0xff]  ;;  %v516_v17 = vpack.c.bf16 %v172_v15, %v171_v14  ;;  %v173_v18 = vld [vmem:[#allocation7 + $0x30] sm:$0xff]  ;;  %v175_v21 = vld [vmem:[#allocation7 + $0x40] sm:$0xff] }
  0x4e   :  { %506 = vmatprep.subr.bf16.mxu0 %v695_v0  ;;  %511 = vmatpush3.bf16.msra.mxu1 %v510_v12  ;;  %v174_v19 = vld [vmem:[#allocation7 + $0x38] sm:$0xff]  ;;  %v176_v22 = vld [vmem:[#allocation7 + $0x48] sm:$0xff]  ;;  %v177_v24 = vld [vmem:[#allocation7 + $0x50] sm:$0xff] }
  0x4f   :  { %512 = vmatprep.subr.bf16.mxu1 %v695_v0  ;;  %v519_v20 = vpack.c.bf16 %v174_v19, %v173_v18  ;;  %v522_v23 = vpack.c.bf16 %v176_v22, %v175_v21  ;;  %v178_v25 = vld [vmem:[#allocation7 + $0x58] sm:$0xff]  ;;  %v179_v27 = vld [vmem:[#allocation7 + $0x60] sm:$0xff]  ;;  %v180_v28 = vld [vmem:[#allocation7 + $0x68] sm:$0xff] }
  0x50   :  { %v525_v26 = vpack.c.bf16 %v178_v25, %v177_v24  ;;  %v528_v29 = vpack.c.bf16 %v180_v28, %v179_v27  ;;  %v181_v30 = vld [vmem:[#allocation7 + $0x70] sm:$0xff]  ;;  %v182_v31 = vld [vmem:[#allocation7 + $0x78] sm:$0xff]  ;;  %v261_v33 = vld [vmem:[#allocation8] sm:$0xff] }
  0x51   :  { %508 = vmatpush3.bf16.msra.mxu0 %v507_v11  ;;  %v531_v32 = vpack.c.bf16 %v182_v31, %v181_v30  ;;  %v262_v34 = vld [vmem:[#allocation8 + $0x8] sm:$0xff]  ;;  %v263_v35 = vld [vmem:[#allocation8 + $0x10] sm:$0xff]  ;;  %v264_v37 = vld [vmem:[#allocation8 + $0x18] sm:$0xff] }
  0x52   :  { %533 = vmatprep.subr.bf16.mxu0 %v695_v0  ;;  %514 = vmatpush3.bf16.msra.mxu1 %v513_v13  ;;  %v534_v36 = vpack.c.bf16 %v262_v34, %v261_v33  ;;  %v537_v38 = vpack.c.bf16 %v264_v37, %v263_v35  ;;  %v265_v39 = vld [vmem:[#allocation8 + $0x20] sm:$0xff]  ;;  %v266_v40 = vld [vmem:[#allocation8 + $0x28] sm:$0xff]  ;;  %v267_v42 = vld [vmem:[#allocation8 + $0x30] sm:$0xff] }
  0x53   :  { %515 = vmatprep.subr.bf16.mxu1 %v695_v0  ;;  %v540_v41 = vpack.c.bf16 %v266_v40, %v265_v39  ;;  %v268_v43 = vld [vmem:[#allocation8 + $0x38] sm:$0xff]  ;;  %v269_v45 = vld [vmem:[#allocation8 + $0x40] sm:$0xff]  ;;  %v270_v46 = vld [vmem:[#allocation8 + $0x48] sm:$0xff] }
  0x54   :  { %431 = vmatmul.mubr.msk.f32.vlgmr.msra.gmra.mrb[0].mxu0 %vm92_vm1, %v80_v16  ;;  %v543_v44 = vpack.c.bf16 %v268_v43, %v267_v42  ;;  %v546_v47 = vpack.c.bf16 %v270_v46, %v269_v45  ;;  %v271_v48 = vld [vmem:[#allocation8 + $0x50] sm:$0xff]  ;;  %v272_v49 = vld [vmem:[#allocation8 + $0x58] sm:$0xff]  ;;  %v273_v51 = vld [vmem:[#allocation8 + $0x60] sm:$0xff] }
  0x55   :  { %500 = vmatprep.mubr.msk.f32.mxu0 %vm696_vm0, %v697_v1  ;;  %535 = vmatpush3.bf16.msra.mxu0 %v534_v36  ;;  %v549_v50 = vpack.c.bf16 %v272_v49, %v271_v48  ;;  %v274_v52 = vld [vmem:[#allocation8 + $0x68] sm:$0xff]  ;;  %v378_v54 = vld [vmem:[%s840_s2] ss:$0 sm:$0xff]  ;;  %v275_v59 = vld [vmem:[#allocation8 + $0x70] sm:$0xff] }
  0x56   :  { %517 = vmatpush3.bf16.msra.mxu1 %v516_v17  ;;  %536 = vmatprep.subr.bf16.mxu0 %v695_v0  ;;  %v552_v53 = vpack.c.bf16 %v274_v52, %v273_v51  ;;  %v276_v60 = vld [vmem:[#allocation8 + $0x78] sm:$0xff] }
  0x57   :  { %518 = vmatprep.subr.bf16.mxu1 %v695_v0  ;;  %v555_v61 = vpack.c.bf16 %v276_v60, %v275_v59  ;;  %v380_v62 = vld [vmem:[%s842_s4] ss:$0 sm:$0xff]  ;;  %s659_s4 = scalar_lea.vmem %s368_s29, 128 }
  0x58   :  { %v381_v3 = vld [vmem:[%s844_s6] ss:$0 sm:$0xff]  ;;  %p660_p4 = scmp.ne.s32.totalorder %s368_s29, %s659_s4  ;;  %p665_p6 = scmp.lt.s32.totalorder %s659_s4, %s659_s4 }
  0x59   :  { %538 = vmatpush3.bf16.msra.mxu0 %v537_v38 }
  0x5a   :  { %520 = vmatpush3.bf16.msra.mxu1 %v519_v20  ;;  %539 = vmatprep.subr.bf16.mxu0 %v695_v0  ;;  %p666_p7 = por %p665_p6, %p664_p5 }
  0x5b   :  { %521 = vmatprep.subr.bf16.mxu1 %v695_v0 }
  0x5c   :  { %p667_p8 = pnand %p666_p7, %p660_p4 }
  0x5d   :  { %541 = vmatpush3.bf16.msra.mxu0 %v540_v41 }
  0x5e   :  { %523 = vmatpush3.bf16.msra.mxu1 %v522_v23  ;;  %542 = vmatprep.subr.bf16.mxu0 %v695_v0 }
  0x5f   :  { %524 = vmatprep.subr.bf16.mxu1 %v695_v0 }
  0x61   :  { %544 = vmatpush3.bf16.msra.mxu0 %v543_v44 }
  0x62   :  { %526 = vmatpush3.bf16.msra.mxu1 %v525_v26  ;;  %545 = vmatprep.subr.bf16.mxu0 %v695_v0 }
  0x63   :  { %527 = vmatprep.subr.bf16.mxu1 %v695_v0 }
  0x65   :  { %547 = vmatpush3.bf16.msra.mxu0 %v546_v47 }
  0x66   :  { %529 = vmatpush3.bf16.msra.mxu1 %v528_v29  ;;  %548 = vmatprep.subr.bf16.mxu0 %v695_v0 }
  0x67   :  { %530 = vmatprep.subr.bf16.mxu1 %v695_v0 }
  0x69   :  { %550 = vmatpush3.bf16.msra.mxu0 %v549_v50 }
  0x6a   :  { %532 = vmatpush3.bf16.msra.mxu1 %v531_v32  ;;  %551 = vmatprep.subr.bf16.mxu0 %v695_v0 }
  0x6d   :  { %553 = vmatpush3.bf16.msra.mxu0 %v552_v53 }
  0x6e   :  { %554 = vmatprep.subr.bf16.mxu0 %v695_v0 }
  0x71   :  { %556 = vmatpush3.bf16.msra.mxu0 %v555_v61 }
 0x127   :  { %v162_v55 = vpop.f32.mrb[0].mxu0 }
 0x128   :  { %v163_v56 = vadd.f32 %v378_v54, %v162_v55  ;;  %v432_v57 = vpop.f32.mrb[1].mxu0 }
 0x12a   :  { %v166_v58 = vmax.f32 %v163_v56, 0.0 }
 0x12c   :  { %466 = vmatmul.mubr.f32.vlgmr.msra.gmra.mrb[0].mxu1 %v166_v58 }
 0x1ff   :  { %v256_v63 = vpop.f32.mrb[0].mxu1 }
 0x200   :  { %v257_v1 = vadd.f32 %v380_v62, %v256_v63  ;;  %v467_v0 = vpop.f32.mrb[1].mxu1 }
 0x202   :  { %v260_v2 = vmax.f32 %v257_v1, 0.0 }
 0x204   :  { %501 = vmatmul.mubr.f32.vlgmr.msra.gmra.mrb[2].mxu0 %v260_v2 }
 0x2d7   :  { %v350_v4 = vpop.f32.mrb[2].mxu0 }
 0x2d8   :  { %v351_v5 = vadd.f32 %v381_v3, %v350_v4  ;;  %v502_v6 = vpop.f32.mrb[3].mxu0 }
 0x2da   :  { %v382_v7 = vmul.f32 -1.442695, %v351_v5 }
 0x2dc   :  { %567 = vpow2.f32 %v382_v7 }
 0x2e6   :  { %v568_v8 = vpop.eup %567 }
 0x2e7   :  { %v357_v9 = vadd.f32 1.0, %v568_v8 }
 0x2e9   :  { %569 = vrcp.f32 %v357_v9 }
 0x2f3   :  { %v570_v10 = vpop.eup %569 }
 0x2f4   :  { %360 = vst [vmem:[#allocation10] sm:$0xff] %v570_v10 }
 0x2f5   :  { %670 = shalt.err (!%p667_p8)
}
 0x2f6   :  { %s671_s8 = scalar_lea.hbm %s845_s7, 128 }
 0x2f7   :  { %p672_p9 = scmp.ne.s32.totalorder %s845_s7, %s671_s8  ;;  %p675_p10 = scmp.lt.u32.totalorder %s671_s8, %s845_s7 }
 0x2f9   :  { %p677_p11 = pnand %p675_p10, %p672_p9 }
 0x2fb   :  { %680 = shalt.err (!%p677_p11)
}
 0x2fc   :  { %370 = dma.vmem_to_hbm [thread:$0]  %s368_s29, 128, %s845_s7, [#allocation4]  }
 0x2fd   :  { %687 = dma.done.wait [#allocation4], 128  }
 0x2fe   :  { %688 = vsyncadd [#allocation4], 4294967168 }
 0x2ff   :  { %374 = vsyncpa [#allocation3], 1 }
 0x300   :  { %375 = vsyncpa [#allocation6], 1 }
 0x301   :  { %376 = vsyncpa [#allocation9], 1 }
 0x302   :  { %377 = vsyncpa [#allocation4], 1 }

</bundles_post_ra>
